<compile_context>
chip_gen: v6e
topology: v6e:2x2x1
jax: 0.10.0
libtpu: 0.0.40
codegen_flags: <defaults>
</compile_context>

<pallas_src>
import functools

import numpy as np
import jax
import jax.numpy as jnp
from jax.experimental import pallas as pl
from jax.experimental.pallas import tpu as pltpu

BN_EPS = 1e-5
HIGH = jax.lax.Precision.HIGHEST  # reference only


@functools.lru_cache(maxsize=None)
def _freq_basis(T, T_pad, fs, band):
    """Shared (cached, on-device) real-Fourier band basis G [T_pad, r_pad].

    Per batch/channel row x[t]:  irfft(rfft(x)*(1+0.5*mask)) == x + 0.5 * x @ (G @ G^T).
    Rows >= T and columns >= r are zero padding.  Returns None when the band is empty.
    """
    t = np.arange(T, dtype=np.float64)
    freqs = np.fft.rfftfreq(T, d=1.0 / fs)
    inband = np.nonzero((freqs >= band[0]) & (freqs <= band[1]))[0]

    cols = []
    for k in inband:
        if k == 0:                               # DC bin
            cols.append(np.full(T, 1.0 / np.sqrt(T)))
        elif 2 * k == T:                         # Nyquist bin (even T)
            cols.append(np.where((np.arange(T) % 2) == 0, 1.0, -1.0) / np.sqrt(T))
        else:                                    # generic bin: cos + sin pair
            w = 2.0 * np.pi * k * t / T
            cols.append(np.sqrt(2.0 / T) * np.cos(w))
            cols.append(np.sqrt(2.0 / T) * np.sin(w))
    r = len(cols)
    if r == 0:
        return None
    r_pad = int(-(-r // 128) * 128)              # lane-dense rank padding
    G = np.zeros((T_pad, r_pad), dtype=np.float32)
    G[:T, :r] = np.stack(cols, axis=1)
    return jax.device_put(G)                     # cached on device, no per-call H2D


def _fused_kernel(*refs, inv_n, use_proj):
    """Grid = (pass, batch).  Pass 0: freq+conv + BN-stat accumulation.
    Pass 1: re-stream, normalize + ReLU, write output."""
    if use_proj:
        (x_ref, g_ref, w_ref, gam_ref, bet_ref, out_ref,
         sum_ref, sumsq_ref, scale_ref, shift_ref) = refs
    else:
        g_ref = None
        (x_ref, w_ref, gam_ref, bet_ref, out_ref,
         sum_ref, sumsq_ref, scale_ref, shift_ref) = refs

    p = pl.program_id(0)                 # 0: stats pass, 1: normalize pass
    b = pl.program_id(1)                 # batch index
    nb = pl.num_programs(1)

    xb = x_ref[0]                                                      # [Cin, Tp]

    # Frequency enhancement via shared low-rank band projector (single G buffer;
    # second matmul is band @ G^T -- no materialized transpose).
    if use_proj:
        g = g_ref[...]                                                 # [Tp, R]
        band = jnp.dot(xb, g, preferred_element_type=jnp.float32)      # [Cin, R]
        enh = xb + 0.5 * jax.lax.dot_general(
            band, g, dimension_numbers=(((1,), (1,)), ((), ())),
            preferred_element_type=jnp.float32)                        # [Cin, Tp]
    else:
        enh = xb

    # Conv1d(kernel_size=1).  Bias omitted: it cancels exactly under training-mode
    # BatchNorm mean subtraction (dead work otherwise).
    y = jnp.dot(w_ref[...], enh, preferred_element_type=jnp.float32)   # [Cout, Tp]

    @pl.when((p == 0) & (b == 0))
    def _():
        sum_ref[...] = jnp.zeros_like(sum_ref)
        sumsq_ref[...] = jnp.zeros_like(sumsq_ref)

    @pl.when(p == 0)
    def _():
        # Sum / sum-of-squares: zero-padded time columns contribute exactly zero.
        sum_ref[...] += y.sum(axis=1, keepdims=True)
        sumsq_ref[...] += (y * y).sum(axis=1, keepdims=True)
        out_ref[0] = y                    # placeholder; overwritten on pass 1

    @pl.when((p == 0) & (b == nb - 1))
    def _():
        mu = sum_ref[...] * inv_n
        var = sumsq_ref[...] * inv_n - mu * mu          # biased variance (train mode)
        sc = jax.lax.rsqrt(var + BN_EPS) * gam_ref[...]
        scale_ref[...] = sc
        shift_ref[...] = bet_ref[...] - mu * sc

    @pl.when(p == 1)
    def _():
        out_ref[0] = jnp.maximum(y * scale_ref[...] + shift_ref[...], 0.0)   # ReLU


def frequency_aware_forward(x, params, *, tremor_freq_band=(3.0, 7.0), fs=100):
    """Pallas implementation of FrequencyAwareModule.forward; x: [B, Cin, T] f32."""
    B, Cin, T = x.shape
    Cout = params["w"].shape[0]

    # Lane-dense time axis: pad T up to a multiple of 128 (pad columns are exact
    # no-ops thanks to the zero-padded basis rows, no conv bias and sum-sq BN stats).
    T_pad = int(pl.cdiv(T, 128) * 128)

    G = _freq_basis(int(T), int(T_pad), float(fs),
                    (float(tremor_freq_band[0]), float(tremor_freq_band[1])))
    use_proj = G is not None

    x = x.astype(jnp.float32)
    if T_pad != T:
        x = jnp.pad(x, ((0, 0), (0, 0), (0, T_pad - T)))

    in_specs = [pl.BlockSpec((1, Cin, T_pad), lambda p, b: (b, 0, 0))]
    args = [x]
    if use_proj:
        in_specs.append(pl.BlockSpec(G.shape, lambda p, b: (0, 0)))
        args.append(G)
    in_specs += [pl.BlockSpec((Cout, Cin), lambda p, b: (0, 0)),
                 pl.BlockSpec((Cout, 1), lambda p, b: (0, 0)),
                 pl.BlockSpec((Cout, 1), lambda p, b: (0, 0))]
    args += [params["w"], params["gamma"], params["beta"]]

    out = pl.pallas_call(
        functools.partial(_fused_kernel, inv_n=1.0 / float(B * T), use_proj=use_proj),
        out_shape=jax.ShapeDtypeStruct((B, Cout, T_pad), jnp.float32),
        grid_spec=pltpu.PrefetchScalarGridSpec(
            num_scalar_prefetch=0,
            grid=(2, B),                      # (pass, batch); pass is outermost
            in_specs=in_specs,
            out_specs=pl.BlockSpec((1, Cout, T_pad), lambda p, b: (b, 0, 0)),
            scratch_shapes=[pltpu.VMEM((Cout, 1), jnp.float32)] * 4),
        compiler_params=pltpu.CompilerParams(
            # Global BN stats couple all batches -> both axes must stay sequential.
            dimension_semantics=("arbitrary", "arbitrary")),
    )(*args)

    return out[..., :T] if T_pad != T else out            # [B, Cout, T]


def init_params(key, Cin, Cout):
    """Deterministic synthetic parameters (Conv1d k=1 weight/bias, BN affine)."""
    k = jax.random.split(key, 4)
    bound = 1.0 / (Cin ** 0.5)
    return {
        "w": jax.random.uniform(k[0], (Cout, Cin), jnp.float32, -bound, bound),
        "b": jax.random.uniform(k[1], (Cout, 1), jnp.float32, -bound, bound),
        "gamma": 1.0 + 0.1 * jax.random.normal(k[2], (Cout, 1), jnp.float32),
        "beta": 0.1 * jax.random.normal(k[3], (Cout, 1), jnp.float32),
    }


def reference_forward(x, params, *, tremor_freq_band=(3.0, 7.0), fs=100):
    """Pure-JAX reference mirroring the PyTorch forward (train-mode BN, real FFTs,
    including the Conv1d bias, which cancels under BN)."""
    B, Cin, T = x.shape
    xf = jnp.fft.rfft(x, axis=2)
    freqs = jnp.fft.rfftfreq(T, d=1.0 / fs)
    mask = ((freqs >= tremor_freq_band[0]) & (freqs <= tremor_freq_band[1])).astype(jnp.float32)
    enh = jnp.fft.irfft(xf * (1.0 + 0.5 * mask)[None, None, :], n=T, axis=2)

    y = jnp.einsum('oc,bct->bot', params["w"], enh, precision=HIGH) + params["b"][None, :, :]
    mu = y.mean(axis=(0, 2), keepdims=True)
    var = ((y - mu) ** 2).mean(axis=(0, 2), keepdims=True)
    yn = (y - mu) * jax.lax.rsqrt(var + BN_EPS) * params["gamma"][None, :, :] + params["beta"][None, :, :]
    return jnp.maximum(yn, 0.0)


if __name__ == "__main__":
    # TODO(synk): BatchNorm running-stat buffers (module training side effect) are not
    # modeled; the forward uses batch statistics exactly like the PyTorch train-mode call.
    B, Cin, Cout, T = 2, 8, 16, 128          # T multiple of 128 -> no padding path
    key = jax.random.PRNGKey(0)
    kx, kp = jax.random.split(key)
    x = jax.random.normal(kx, (B, Cin, T), jnp.float32)
    params = init_params(kp, Cin, Cout)

    fwd = jax.jit(frequency_aware_forward)   # bakes the cached basis as a constant
    out = jax.block_until_ready(fwd(x, params))
    assert out.shape == (B, Cout, T) and out.dtype == jnp.float32

    ref = jax.block_until_ready(reference_forward(x, params))
    assert jnp.allclose(out, ref, rtol=2e-2, atol=2e-2), \
        f"max abs diff {jnp.max(jnp.abs(out - ref))}"

    print("KERNEL_OK")
</pallas_src>

<mosaic_0001>
module attributes {stable_mosaic.version = 11 : i64} {
  func.func @_fused_kernel(%arg0: i32, %arg1: i32, %arg2: memref<1x8x128xf32, #tpu.memory_space<vmem>>, %arg3: memref<128x128xf32, #tpu.memory_space<vmem>>, %arg4: memref<16x8xf32, #tpu.memory_space<vmem>>, %arg5: memref<16x1xf32, #tpu.memory_space<vmem>>, %arg6: memref<16x1xf32, #tpu.memory_space<vmem>>, %arg7: memref<1x16x128xf32, #tpu.memory_space<vmem>>, %arg8: memref<16x1xf32, #tpu.memory_space<vmem>>, %arg9: memref<16x1xf32, #tpu.memory_space<vmem>>, %arg10: memref<16x1xf32, #tpu.memory_space<vmem>>, %arg11: memref<16x1xf32, #tpu.memory_space<vmem>>) attributes {dimension_semantics = [#tpu.dimension_semantics<arbitrary>, #tpu.dimension_semantics<arbitrary>], iteration_bounds = array<i64: 2, 2>, scalar_prefetch = 0 : i64, scratch_operands = 4 : i64, tpu.core_type = #tpu.core_type<tc>, window_params = [{transform_indices = @transform_0, window_bounds = array<i64: 1, 8, 128>}, {pipeline_mode = #tpu.pipeline_mode<synchronous>, transform_indices = @transform_1, window_bounds = array<i64: 128, 128>}, {pipeline_mode = #tpu.pipeline_mode<synchronous>, transform_indices = @transform_2, window_bounds = array<i64: 16, 8>}, {pipeline_mode = #tpu.pipeline_mode<synchronous>, transform_indices = @transform_3, window_bounds = array<i64: 16, 1>}, {pipeline_mode = #tpu.pipeline_mode<synchronous>, transform_indices = @transform_4, window_bounds = array<i64: 16, 1>}, {transform_indices = @transform_5, window_bounds = array<i64: 1, 16, 128>}]} {
    %c0 = arith.constant 0 : index
    %c0_0 = arith.constant 0 : index
    %c0_1 = arith.constant 0 : index
    %0 = vector.load %arg2[%c0, %c0_0, %c0_1] : memref<1x8x128xf32, #tpu.memory_space<vmem>>, vector<1x8x128xf32>
    %1 = vector.shape_cast %0 : vector<1x8x128xf32> to vector<8x128xf32>
    %c0_2 = arith.constant 0 : index
    %c0_3 = arith.constant 0 : index
    %2 = vector.load %arg3[%c0_2, %c0_3] : memref<128x128xf32, #tpu.memory_space<vmem>>, vector<128x128xf32>
    %cst = arith.constant dense<0.000000e+00> : vector<8x128xf32>
    %3 = tpu.matmul %1, %2, %cst {dimension_numbers = #tpu.dot_dimension_numbers<[1], [0], [0], [1], [0, 0, 1, 1], [], []>} : vector<8x128xf32>, vector<128x128xf32>, vector<8x128xf32> -> vector<8x128xf32>
    %cst_4 = arith.constant dense<0.000000e+00> : vector<8x128xf32>
    %4 = tpu.matmul %3, %2, %cst_4 {dimension_numbers = #tpu.dot_dimension_numbers<[1], [1], [0], [0], [0, 0, 1, 0], [], []>} : vector<8x128xf32>, vector<128x128xf32>, vector<8x128xf32> -> vector<8x128xf32>
    %cst_5 = arith.constant 5.000000e-01 : f32
    %5 = vector.broadcast %cst_5 : f32 to vector<8x128xf32>
    %6 = arith.mulf %5, %4 : vector<8x128xf32>
    %7 = arith.addf %1, %6 : vector<8x128xf32>
    %c0_6 = arith.constant 0 : index
    %c0_7 = arith.constant 0 : index
    %8 = vector.load %arg4[%c0_6, %c0_7] : memref<16x8xf32, #tpu.memory_space<vmem>>, vector<16x8xf32>
    %cst_8 = arith.constant dense<0.000000e+00> : vector<16x128xf32>
    %9 = tpu.matmul %8, %7, %cst_8 {dimension_numbers = #tpu.dot_dimension_numbers<[1], [0], [0], [1], [0, 0, 1, 1], [], []>} : vector<16x8xf32>, vector<8x128xf32>, vector<16x128xf32> -> vector<16x128xf32>
    %c0_i32 = arith.constant 0 : i32
    %10 = arith.cmpi eq, %arg0, %c0_i32 : i32
    %c0_i32_9 = arith.constant 0 : i32
    %11 = arith.cmpi eq, %arg1, %c0_i32_9 : i32
    %12 = arith.andi %10, %11 : i1
    %13 = arith.extui %12 : i1 to i32
    %c0_i32_10 = arith.constant 0 : i32
    %14 = arith.cmpi ne, %13, %c0_i32_10 : i32
    scf.if %14 {
      %cst_17 = arith.constant 0.000000e+00 : f32
      %26 = vector.broadcast %cst_17 : f32 to vector<16x1xf32>
      %c0_18 = arith.constant 0 : index
      %c0_19 = arith.constant 0 : index
      %27 = vector.load %arg8[%c0_18, %c0_19] : memref<16x1xf32, #tpu.memory_space<vmem>>, vector<16x1xf32>
      tpu.vector_store %arg8[%c0_18, %c0_19], %26 {strides = array<i32>} : memref<16x1xf32, #tpu.memory_space<vmem>>, vector<16x1xf32>,
      %cst_20 = arith.constant 0.000000e+00 : f32
      %28 = vector.broadcast %cst_20 : f32 to vector<16x1xf32>
      %c0_21 = arith.constant 0 : index
      %c0_22 = arith.constant 0 : index
      %29 = vector.load %arg9[%c0_21, %c0_22] : memref<16x1xf32, #tpu.memory_space<vmem>>, vector<16x1xf32>
      tpu.vector_store %arg9[%c0_21, %c0_22], %28 {strides = array<i32>} : memref<16x1xf32, #tpu.memory_space<vmem>>, vector<16x1xf32>,
    } else {
    }
    %c0_i32_11 = arith.constant 0 : i32
    %15 = arith.cmpi eq, %arg0, %c0_i32_11 : i32
    %16 = arith.extui %15 : i1 to i32
    %c0_i32_12 = arith.constant 0 : i32
    %17 = arith.cmpi ne, %16, %c0_i32_12 : i32
    scf.if %17 {
      %c0_17 = arith.constant 0 : index
      %c0_18 = arith.constant 0 : index
      %26 = vector.load %arg8[%c0_17, %c0_18] : memref<16x1xf32, #tpu.memory_space<vmem>>, vector<16x1xf32>
      %cst_19 = arith.constant dense<0.000000e+00> : vector<16xf32>
      %27 = vector.multi_reduction <add>, %9, %cst_19 [1] : vector<16x128xf32> to vector<16xf32>
      %28 = vector.shape_cast %27 : vector<16xf32> to vector<16x1xf32>
      %29 = arith.addf %26, %28 : vector<16x1xf32>
      %c0_20 = arith.constant 0 : index
      %c0_21 = arith.constant 0 : index
      %30 = vector.load %arg8[%c0_20, %c0_21] : memref<16x1xf32, #tpu.memory_space<vmem>>, vector<16x1xf32>
      tpu.vector_store %arg8[%c0_20, %c0_21], %29 {strides = array<i32>} : memref<16x1xf32, #tpu.memory_space<vmem>>, vector<16x1xf32>,
      %c0_22 = arith.constant 0 : index
      %c0_23 = arith.constant 0 : index
      %31 = vector.load %arg9[%c0_22, %c0_23] : memref<16x1xf32, #tpu.memory_space<vmem>>, vector<16x1xf32>
      %32 = arith.mulf %9, %9 : vector<16x128xf32>
      %cst_24 = arith.constant dense<0.000000e+00> : vector<16xf32>
      %33 = vector.multi_reduction <add>, %32, %cst_24 [1] : vector<16x128xf32> to vector<16xf32>
      %34 = vector.shape_cast %33 : vector<16xf32> to vector<16x1xf32>
      %35 = arith.addf %31, %34 : vector<16x1xf32>
      %c0_25 = arith.constant 0 : index
      %c0_26 = arith.constant 0 : index
      %36 = vector.load %arg9[%c0_25, %c0_26] : memref<16x1xf32, #tpu.memory_space<vmem>>, vector<16x1xf32>
      tpu.vector_store %arg9[%c0_25, %c0_26], %35 {strides = array<i32>} : memref<16x1xf32, #tpu.memory_space<vmem>>, vector<16x1xf32>,
      %c0_27 = arith.constant 0 : index
      %c0_28 = arith.constant 0 : index
      %c0_29 = arith.constant 0 : index
      %37 = vector.load %arg7[%c0_27, %c0_28, %c0_29] : memref<1x16x128xf32, #tpu.memory_space<vmem>>, vector<1x16x128xf32>
      %38 = vector.shape_cast %37 : vector<1x16x128xf32> to vector<16x128xf32>
      %39 = vector.shape_cast %9 : vector<16x128xf32> to vector<1x16x128xf32>
      tpu.vector_store %arg7[%c0_27, %c0_28, %c0_29], %39 {strides = array<i32>} : memref<1x16x128xf32, #tpu.memory_space<vmem>>, vector<1x16x128xf32>,
    } else {
    }
    %c0_i32_13 = arith.constant 0 : i32
    %18 = arith.cmpi eq, %arg0, %c0_i32_13 : i32
    %c1_i32 = arith.constant 1 : i32
    %19 = arith.cmpi eq, %arg1, %c1_i32 : i32
    %20 = arith.andi %18, %19 : i1
    %21 = arith.extui %20 : i1 to i32
    %c0_i32_14 = arith.constant 0 : i32
    %22 = arith.cmpi ne, %21, %c0_i32_14 : i32
    scf.if %22 {
      %c0_17 = arith.constant 0 : index
      %c0_18 = arith.constant 0 : index
      %26 = vector.load %arg8[%c0_17, %c0_18] : memref<16x1xf32, #tpu.memory_space<vmem>>, vector<16x1xf32>
      %cst_19 = arith.constant 3.906250e-03 : f32
      %27 = vector.broadcast %cst_19 : f32 to vector<16x1xf32>
      %28 = arith.mulf %26, %27 : vector<16x1xf32>
      %c0_20 = arith.constant 0 : index
      %c0_21 = arith.constant 0 : index
      %29 = vector.load %arg9[%c0_20, %c0_21] : memref<16x1xf32, #tpu.memory_space<vmem>>, vector<16x1xf32>
      %cst_22 = arith.constant 3.906250e-03 : f32
      %30 = vector.broadcast %cst_22 : f32 to vector<16x1xf32>
      %31 = arith.mulf %29, %30 : vector<16x1xf32>
      %32 = arith.mulf %28, %28 : vector<16x1xf32>
      %33 = arith.subf %31, %32 : vector<16x1xf32>
      %cst_23 = arith.constant 9.99999974E-6 : f32
      %34 = vector.broadcast %cst_23 : f32 to vector<16x1xf32>
      %35 = arith.addf %33, %34 : vector<16x1xf32>
      %36 = math.rsqrt %35 : vector<16x1xf32>
      %c0_24 = arith.constant 0 : index
      %c0_25 = arith.constant 0 : index
      %37 = vector.load %arg5[%c0_24, %c0_25] : memref<16x1xf32, #tpu.memory_space<vmem>>, vector<16x1xf32>
      %38 = arith.mulf %36, %37 : vector<16x1xf32>
      %c0_26 = arith.constant 0 : index
      %c0_27 = arith.constant 0 : index
      %39 = vector.load %arg10[%c0_26, %c0_27] : memref<16x1xf32, #tpu.memory_space<vmem>>, vector<16x1xf32>
      tpu.vector_store %arg10[%c0_26, %c0_27], %38 {strides = array<i32>} : memref<16x1xf32, #tpu.memory_space<vmem>>, vector<16x1xf32>,
      %c0_28 = arith.constant 0 : index
      %c0_29 = arith.constant 0 : index
      %40 = vector.load %arg6[%c0_28, %c0_29] : memref<16x1xf32, #tpu.memory_space<vmem>>, vector<16x1xf32>
      %41 = arith.mulf %28, %38 : vector<16x1xf32>
      %42 = arith.subf %40, %41 : vector<16x1xf32>
      %c0_30 = arith.constant 0 : index
      %c0_31 = arith.constant 0 : index
      %43 = vector.load %arg11[%c0_30, %c0_31] : memref<16x1xf32, #tpu.memory_space<vmem>>, vector<16x1xf32>
      tpu.vector_store %arg11[%c0_30, %c0_31], %42 {strides = array<i32>} : memref<16x1xf32, #tpu.memory_space<vmem>>, vector<16x1xf32>,
    } else {
    }
    %c1_i32_15 = arith.constant 1 : i32
    %23 = arith.cmpi eq, %arg0, %c1_i32_15 : i32
    %24 = arith.extui %23 : i1 to i32
    %c0_i32_16 = arith.constant 0 : i32
    %25 = arith.cmpi ne, %24, %c0_i32_16 : i32
    scf.if %25 {
      %c0_17 = arith.constant 0 : index
      %c0_18 = arith.constant 0 : index
      %26 = vector.load %arg10[%c0_17, %c0_18] : memref<16x1xf32, #tpu.memory_space<vmem>>, vector<16x1xf32>
      %27 = vector.broadcast %26 : vector<16x1xf32> to vector<16x128xf32>
      %28 = arith.mulf %9, %27 : vector<16x128xf32>
      %c0_19 = arith.constant 0 : index
      %c0_20 = arith.constant 0 : index
      %29 = vector.load %arg11[%c0_19, %c0_20] : memref<16x1xf32, #tpu.memory_space<vmem>>, vector<16x1xf32>
      %30 = vector.broadcast %29 : vector<16x1xf32> to vector<16x128xf32>
      %31 = arith.addf %28, %30 : vector<16x128xf32>
      %cst_21 = arith.constant 0.000000e+00 : f32
      %32 = vector.broadcast %cst_21 : f32 to vector<16x128xf32>
      %33 = arith.maximumf %31, %32 : vector<16x128xf32>
      %c0_22 = arith.constant 0 : index
      %c0_23 = arith.constant 0 : index
      %c0_24 = arith.constant 0 : index
      %34 = vector.load %arg7[%c0_22, %c0_23, %c0_24] : memref<1x16x128xf32, #tpu.memory_space<vmem>>, vector<1x16x128xf32>
      %35 = vector.shape_cast %34 : vector<1x16x128xf32> to vector<16x128xf32>
      %36 = vector.shape_cast %33 : vector<16x128xf32> to vector<1x16x128xf32>
      tpu.vector_store %arg7[%c0_22, %c0_23, %c0_24], %36 {strides = array<i32>} : memref<1x16x128xf32, #tpu.memory_space<vmem>>, vector<1x16x128xf32>,
    } else {
    }
    return
  }
  func.func @transform_0(%arg0: i32, %arg1: i32) -> (i32, i32, i32) {
    %c0_i32 = arith.constant 0 : i32
    %c0_i32_0 = arith.constant 0 : i32
    %c0_i32_1 = arith.constant 0 : i32
    return %arg1, %c0_i32, %c0_i32_0 : i32, i32, i32
  }
  func.func @transform_1(%arg0: i32, %arg1: i32) -> (i32, i32) {
    %c0_i32 = arith.constant 0 : i32
    %c0_i32_0 = arith.constant 0 : i32
    %c0_i32_1 = arith.constant 0 : i32
    return %c0_i32, %c0_i32_0 : i32, i32
  }
  func.func @transform_2(%arg0: i32, %arg1: i32) -> (i32, i32) {
    %c0_i32 = arith.constant 0 : i32
    %c0_i32_0 = arith.constant 0 : i32
    %c0_i32_1 = arith.constant 0 : i32
    return %c0_i32, %c0_i32_0 : i32, i32
  }
  func.func @transform_3(%arg0: i32, %arg1: i32) -> (i32, i32) {
    %c0_i32 = arith.constant 0 : i32
    %c0_i32_0 = arith.constant 0 : i32
    %c0_i32_1 = arith.constant 0 : i32
    return %c0_i32, %c0_i32_0 : i32, i32
  }
  func.func @transform_4(%arg0: i32, %arg1: i32) -> (i32, i32) {
    %c0_i32 = arith.constant 0 : i32
    %c0_i32_0 = arith.constant 0 : i32
    %c0_i32_1 = arith.constant 0 : i32
    return %c0_i32, %c0_i32_0 : i32, i32
  }
  func.func @transform_5(%arg0: i32, %arg1: i32) -> (i32, i32, i32) {
    %c0_i32 = arith.constant 0 : i32
    %c0_i32_0 = arith.constant 0 : i32
    %c0_i32_1 = arith.constant 0 : i32
    return %arg1, %c0_i32, %c0_i32_0 : i32, i32, i32
  }
}

</mosaic_0001>

<bundles_post_ra>
// kernel: frequency_aware_forward.1
= control target key start
LH: loop header
LB: loop body
LE: loop exit
PB: predicated region body
PF: predicated region fallthrough
CT: control target
= control target key end

     0   :  { %10 = vsyncpa [#allocation7], 0  ;;  %s1335_s0 = inlined_call_operand.vmem [shape: f32[2,8,128], index: 0, kind: input, shape index: {}]   ;;  %s1336_s1 = inlined_call_operand.hbm [shape: f32[128,128], index: 1, kind: input, shape index: {}]   ;;  %s1337_s2 = inlined_call_operand.vmem [shape: f32[16,8], index: 2, kind: input, shape index: {}]   ;;  %s1338_s3 = inlined_call_operand.vmem [shape: f32[16,1], index: 3, kind: input, shape index: {}]   ;;  %s1339_s4 = inlined_call_operand.vmem [shape: f32[16,1], index: 4, kind: input, shape index: {}]   ;;  %s1340_s5 = inlined_call_operand.hbm [shape: f32[2,16,128], index: 5, kind: output, shape index: {}]  }
   0x1   :  { %11 = vsyncpa [#allocation8], 0 }
   0x2   :  { %13 = vsyncpa [#allocation8 + $0x1], 0  ;;  %s1091_s18 = smov 0   ;;  %s1093_s19 = smov 0  }
   0x3   :  { %s1095_s20 = smov 0   ;;  %s1097_s21 = smov 0  }
   0x4   :  { %s1099_s22 = smov 0   ;;  %s1101_s23 = smov 0  }
   0x5   :  { %s1103_s24 = smov 0   ;;  %s1105_s25 = smov 0  }
   0x6 LB: > { %s700_s26 = sadd.s32 4294967295, %s1049_s25   ;;  %s701_s27 = sadd.s32 4294967294, %s1049_s25   ;;  %s1049_s25 = sphi %s1105_s25, %s19_s25   ;;  %s1045_s24 = sphi %s1103_s24, %s1352_s24   ;;  %s1041_s23 = sphi %s1101_s23, %s1351_s23   ;;  %s1037_s22 = sphi %s1099_s22, %s1350_s22   ;;  %s1033_s21 = sphi %s1097_s21, %s1349_s21   ;;  %s1029_s20 = sphi %s1095_s20, %s1348_s20   ;;  %s1025_s19 = sphi %s1093_s19, %s1347_s19   ;;  %s1021_s18 = sphi %s1091_s18, %s1346_s18  }
   0x7   : > { %s28_s28 = sadd.s32 1, %s1041_s23  ;;  %s31_s29 = sadd.s32 1, %s1045_s24 }
   0x8   : > { %p29_p0 = scmp.ge.s32.totalorder %s28_s28, 2  ;;  %s148_s30 = sadd.s32 1, %s1029_s20 }
   0x9   : > { %p158_p1 = scmp.ne.s32.totalorder %s1029_s20, %s1025_s19  ;;  %p159_p2 = scmp.eq.s32.totalorder %s700_s26, 3 }
   0xa   : > { %s1354_s28 = smov (%p29_p0, %s28_s28), 0  ;;  %s1356_s29 = smov (!%p29_p0, %s31_s29), %s1045_s24 }
   0xb   : > { %s145_s6 = ssub.s32 %s1041_s23, %s1354_s28  ;;  %p1143_p3 = por %p159_p2, %p158_p1 }
   0xc   : > { %p33_p4 = scmp.ge.s32.totalorder %s1356_s29, 2  ;;  %p146_p5 = scmp.eq.s32.totalorder %s145_s6, 0 }
   0xd   : > { %p164_p6 = scmp.ne.s32.totalorder %s1025_s19, %s1021_s18  ;;  %p165_p7 = scmp.eq.s32.totalorder %s701_s27, 3 }
   0xe   : > { %s1358_s29 = smov (%p33_p4, %s1356_s29), 0  ;;  %p702_p9 = scmp.ge.s32.totalorder %s1049_s25, 1 }
   0xf   : > { %s1152_s8 = scalar_select %p146_p5, %s1029_s20, %s148_s30  }
  0x10   : > { %p1154_p8 = por %p165_p7, %p164_p6  ;;  %p172_p10 = scmp.lt.s32.totalorder %s1049_s25, 5 }
  0x11   : > { %p1160_p11 = scmp.eq.s32.totalorder %s700_s26, 0  ;;  %s1051_s12 = smov [#allocation6]  }
  0x12   : > { %s1342_s9 = scalar_select %p1154_p8, 1, 0 }
  0x13   : > { %p1164_p12 = pnand %p702_p9, %p172_p10  ;;  %s184_s13 = sshll.u32 %s1051_s12, 4  ;;  %s185_s13 = int_to_ptr.vmem [resolvable:$true] %s184_s13 }
  0x14   : > { %s938_s14 = scalar_lea.vmem %s185_s13, 2048  ;;  %p946_p6 = scmp.lt.s32.totalorder %s185_s13, %s185_s13 }
  0x15   : > { %p837_p13 = pneg %p1164_p12  ;;  %p939_p2 = scmp.ne.s32.totalorder %s185_s13, %s938_s14 }
  0x16   : > { %p947_p7 = scmp.lt.s32.totalorder %s938_s14, %s938_s14 }
  0x17   : > { %p838_p0 = pnand %p1160_p11, %p837_p13 }
  0x18   : > { %p948_p8 = por %p947_p7, %p946_p6 }
  0x19   : > { %p929_p1 = pneg %p838_p0 }
  0x1b   : > { %p941_p4 = pnand %p939_p2, %p929_p1 }
  0x1d   : > { %p942_p5 = pneg %p941_p4 }
  0x1f   : > { %p949_p9 = pnand %p948_p8, %p942_p5 }
  0x21   : > { %952 = shalt.err (!%p949_p9)
}
  0x22   : > { %s1052_s15 = smov 128   ;;  %s1053_s16 = smov 8  }
  0x23   : > { %840 = dma.hbm_to_vmem [thread:$0]  (!%p838_p0), %s1336_s1, 2048, %s185_s13, [#allocation7], %s1052_s15, %s1052_s15, %s1053_s16  }
  0x24   : > { %216 = sbr.rel (%p1164_p12) target bundleno = 1028 (0x404), region = 40 }
  0x29   : > { %1012 = dma.done.wait (%p1160_p11), [#allocation7], 2048  }
  0x2a   : > { %1014 = vsyncadd (%p1160_p11), [#allocation7], 4294965248  ;;  %s240_s27 = sand.u32 1, %s1025_s19   ;;  %v1054_v0 = vmov 0.0   ;;  %vm1055_vm0 = vmmov 0   ;;  %v263_v1 = vld [vmem:[#allocation6 + $0x78] sm:$0xff] }
  0x2b   : > { %s1184_s30 = sshll.u32 %s240_s27, 4  ;;  %756 = vmatprep.subr.mxu0 %v1054_v0  ;;  %788 = vmatprep.mubr.msk.f32.mxu0 %vm1055_vm0, %v1054_v0  ;;  %v262_v2 = vld [vmem:[#allocation6 + $0x70] sm:$0xff]  ;;  %v261_v3 = vld [vmem:[#allocation6 + $0x68] sm:$0xff]  ;;  %v260_v4 = vld [vmem:[#allocation6 + $0x60] sm:$0xff]  ;;  %p243_p8 = scmp.lt.s32.totalorder %s1033_s21, 1  ;;  %vm408_vm1 = vcmask 64512  }
  0x2c   : > { %791 = vmatprep.subr.mxu1 %v1054_v0  ;;  %823 = vmatprep.mubr.msk.f32.mxu1 %vm1055_vm0, %v1054_v0  ;;  %v259_v5 = vld [vmem:[#allocation6 + $0x58] sm:$0xff]  ;;  %v258_v6 = vld [vmem:[#allocation6 + $0x50] sm:$0xff]  ;;  %v257_v7 = vld [vmem:[#allocation6 + $0x48] sm:$0xff]  ;;  %p490_p10 = scmp.eq.s32.totalorder %s1037_s22, 0  ;;  %p491_p11 = scmp.eq.s32.totalorder %s1033_s21, 0 }
  0x2d   : > { %757 = vmatpush3.msra.mxu0 %v263_v1  ;;  %792 = vmatpush3.xpose.msra.mxu1 %v263_v1  ;;  %v256_v8 = vld [vmem:[#allocation6 + $0x40] sm:$0xff]  ;;  %v255_v9 = vld [vmem:[#allocation6 + $0x38] sm:$0xff]  ;;  %v254_v10 = vld [vmem:[#allocation6 + $0x30] sm:$0xff]  ;;  %s244_s6 = scalar_select %p243_p8, %s1033_s21, 1 }
  0x2e   : > { %758 = vmatprep.subr.mxu0 %v1054_v0  ;;  %793 = vmatprep.subr.mxu1 %v1054_v0  ;;  %v253_v11 = vld [vmem:[#allocation6 + $0x28] sm:$0xff]  ;;  %v252_v12 = vld [vmem:[#allocation6 + $0x20] sm:$0xff]  ;;  %v251_v13 = vld [vmem:[#allocation6 + $0x18] sm:$0xff]  ;;  %p492_p12 = pnand %p491_p11, %p490_p10  ;;  %s1240_s26 = scalar_lea.vmem [#allocation9], %s1184_s30 }
  0x2f   : > { %759 = vmatpush3.msra.mxu0 %v262_v2  ;;  %s708_s10 = sshll.u32 %s244_s6, 3  ;;  %v250_v14 = vld [vmem:[#allocation6 + $0x10] sm:$0xff]  ;;  %v249_v15 = vld [vmem:[#allocation6 + $0x8] sm:$0xff]  ;;  %v248_v16 = vld [vmem:[#allocation6] sm:$0xff] }
  0x30   : > { %760 = vmatprep.subr.mxu0 %v1054_v0  ;;  %s246_s13 = scalar_lea.vmem %s1335_s0, %s708_s10  ;;  %v406_v20 = vld [vmem:[%s1337_s2] sm:$0xff]  ;;  %v407_v25 = vld [vmem:[%s1337_s2 + $0x8] sm:$0xff] }
  0x31   : > { %761 = vmatpush3.msra.mxu0 %v261_v3  ;;  %794 = vmatpush3.xpose.msra.mxu1 %v262_v2  ;;  %v247_v17 = vld [vmem:[%s246_s13] sm:$0xff] }
  0x32   : > { %762 = vmatprep.subr.mxu0 %v1054_v0  ;;  %795 = vmatprep.subr.mxu1 %v1054_v0 }
  0x33   : > { %763 = vmatpush3.msra.mxu0 %v260_v4 }
  0x34   : > { %764 = vmatprep.subr.mxu0 %v1054_v0 }
  0x35   : > { %765 = vmatpush3.msra.mxu0 %v259_v5  ;;  %796 = vmatpush3.xpose.msra.mxu1 %v261_v3 }
  0x36   : > { %766 = vmatprep.subr.mxu0 %v1054_v0  ;;  %797 = vmatprep.subr.mxu1 %v1054_v0 }
  0x37   : > { %767 = vmatpush3.msra.mxu0 %v258_v6 }
  0x38   : > { %768 = vmatprep.subr.mxu0 %v1054_v0 }
  0x39   : > { %769 = vmatpush3.msra.mxu0 %v257_v7  ;;  %798 = vmatpush3.xpose.msra.mxu1 %v260_v4 }
  0x3a   : > { %770 = vmatprep.subr.mxu0 %v1054_v0  ;;  %799 = vmatprep.subr.mxu1 %v1054_v0 }
  0x3b   : > { %771 = vmatpush3.msra.mxu0 %v256_v8 }
  0x3c   : > { %772 = vmatprep.subr.mxu0 %v1054_v0 }
  0x3d   : > { %773 = vmatpush3.msra.mxu0 %v255_v9  ;;  %800 = vmatpush3.xpose.msra.mxu1 %v259_v5 }
  0x3e   : > { %774 = vmatprep.subr.mxu0 %v1054_v0  ;;  %801 = vmatprep.subr.mxu1 %v1054_v0 }
  0x3f   : > { %775 = vmatpush3.msra.mxu0 %v254_v10 }
  0x40   : > { %776 = vmatprep.subr.mxu0 %v1054_v0 }
  0x41   : > { %777 = vmatpush3.msra.mxu0 %v253_v11  ;;  %802 = vmatpush3.xpose.msra.mxu1 %v258_v6 }
  0x42   : > { %778 = vmatprep.subr.mxu0 %v1054_v0  ;;  %803 = vmatprep.subr.mxu1 %v1054_v0 }
  0x43   : > { %779 = vmatpush3.msra.mxu0 %v252_v12 }
  0x44   : > { %780 = vmatprep.subr.mxu0 %v1054_v0 }
  0x45   : > { %781 = vmatpush3.msra.mxu0 %v251_v13  ;;  %804 = vmatpush3.xpose.msra.mxu1 %v257_v7 }
  0x46   : > { %782 = vmatprep.subr.mxu0 %v1054_v0  ;;  %805 = vmatprep.subr.mxu1 %v1054_v0 }
  0x47   : > { %783 = vmatpush3.msra.mxu0 %v250_v14 }
  0x48   : > { %784 = vmatprep.subr.mxu0 %v1054_v0 }
  0x49   : > { %785 = vmatpush3.msra.mxu0 %v249_v15  ;;  %806 = vmatpush3.xpose.msra.mxu1 %v256_v8 }
  0x4a   : > { %786 = vmatprep.subr.mxu0 %v1054_v0  ;;  %807 = vmatprep.subr.mxu1 %v1054_v0 }
  0x4b   : > { %787 = vmatpush3.msra.mxu0 %v248_v16 }
  0x4c   : > { %789 = vmatmul.mubr.f32.vlgmr.msra.gmra.mxu0 %v247_v17 }
  0x4d   : > { %808 = vmatpush3.xpose.msra.mxu1 %v255_v9  ;;  %828 = vmatprep.mubr.msk.f32.mxu0 %vm408_vm1, %v406_v20 }
  0x4e   : > { %809 = vmatprep.subr.mxu1 %v1054_v0 }
  0x51   : > { %810 = vmatpush3.xpose.msra.mxu1 %v254_v10 }
  0x52   : > { %811 = vmatprep.subr.mxu1 %v1054_v0 }
  0x55   : > { %812 = vmatpush3.xpose.msra.mxu1 %v253_v11 }
  0x56   : > { %813 = vmatprep.subr.mxu1 %v1054_v0 }
  0x59   : > { %814 = vmatpush3.xpose.msra.mxu1 %v252_v12 }
  0x5a   : > { %815 = vmatprep.subr.mxu1 %v1054_v0 }
  0x5d   : > { %816 = vmatpush3.xpose.msra.mxu1 %v251_v13 }
  0x5e   : > { %817 = vmatprep.subr.mxu1 %v1054_v0 }
  0x61   : > { %818 = vmatpush3.xpose.msra.mxu1 %v250_v14 }
  0x62   : > { %819 = vmatprep.subr.mxu1 %v1054_v0 }
  0x65   : > { %820 = vmatpush3.xpose.msra.mxu1 %v249_v15 }
  0x66   : > { %821 = vmatprep.subr.mxu1 %v1054_v0 }
  0x69   : > { %822 = vmatpush3.xpose.msra.mxu1 %v248_v16 }
 0x10c   : > { %v330_v18 = vpop.f32.mrf.mxu0 }
 0x10d   : > { %824 = vmatmul.mubr.f32.vlgmr.msra.gmra.mxu1 %v330_v18 }
 0x10e   : > { %v790_v19 = vpop.f32.mrf.mxu0 }
 0x1cd   : > { %v400_v21 = vpop.f32.mrf.mxu1 }
 0x1ce   : > { %v404_v22 = vmul.f32 0.5, %v400_v21 }
 0x1cf   : > { %v825_v23 = vpop.f32.mrf.mxu1 }
 0x1d0   : > { %v405_v24 = vadd.f32 %v404_v22, %v247_v17 }
 0x1d2   : > { %826 = vmatprep.subr.mxu0 %v405_v24 }
 0x1d3   : > { %827 = vmatpush3.msra.mxu0 %v405_v24 }
 0x1d4   : > { %829 = vmatmul.mubr.msk.f32.vlgmr.msra.gmra.mxu0 %vm408_vm1, %v407_v25 }
 0x292   : > { %495 = sbr.rel (%p492_p12) target bundleno = 666 (0x29a), region = 48 }
 0x294   : > { %v1235_v26 = vpop.f32.mrf.mxu0 }
 0x296   : > { %v1237_v27 = vpop.f32.mrf.mxu0 }
 0x297   : > { %vm496_vm2 = vcmask 7168   ;;  %v1056_v28 = vmov 0.0  }
 0x298   : > { %497 = vst.msk [vmem:[#allocation2] sm:$0xff] %vm496_vm2, %v1056_v28  ;;  %498 = vst.msk [vmem:[#allocation2 + $0x8] sm:$0xff] %vm496_vm2, %v1056_v28 }
 0x299   : > { %499 = vst.msk [vmem:[#allocation3] sm:$0xff] %vm496_vm2, %v1056_v28  ;;  %500 = vst.msk [vmem:[#allocation3 + $0x8] sm:$0xff] %vm496_vm2, %v1056_v28 }
 0x29a PF: > { %p711_p13 = scmp.ne.s32.totalorder %s1037_s22, 0 }
 0x29c   : > { %503 = sbr.rel (%p711_p13) target bundleno = 820 (0x334), region = 52 }
 0x2a1   : > { %506 = vadd.xlane.f32.xlu0 %v1237_v27  ;;  %v517_v29 = vmul.f32 %v1237_v27, %v1237_v27  ;;  %527 = vst [vmem:[%s1240_s26] sm:$0xff] %v1237_v27  ;;  %528 = vst [vmem:[%s1240_s26 + $0x8] sm:$0xff] %v1235_v26  ;;  %v518_v30 = vmul.f32 %v1235_v26, %v1235_v26  ;;  %v504_v31 = vld [vmem:[#allocation2] sm:$0xff]  ;;  %vm512_vm3 = vcmask 7168   ;;  %v515_v33 = vld [vmem:[#allocation3] sm:$0xff] }
 0x2a2   : > { %v505_v36 = vld [vmem:[#allocation2 + $0x8] sm:$0xff]  ;;  %v516_v39 = vld [vmem:[#allocation3 + $0x8] sm:$0xff] }
 0x2a3   : > { %519 = vadd.xlane.f32.xlu1 %v517_v29 }
 0x2a5   : > { %508 = vadd.xlane.f32.xlu0 %v1235_v26 }
 0x2a7   : > { %521 = vadd.xlane.f32.xlu1 %v518_v30 }
 0x32a   : > { %v507_v32 = vpop.xlane.xlu0 %506 }
 0x32b   : > { %v510_v34 = vadd.f32 %v507_v32, %v504_v31 }
 0x32c   : > { %v520_v35 = vpop.xlane.xlu1 %519 }
 0x32d   : > { %513 = vst.msk [vmem:[#allocation2] sm:$0xff] %vm512_vm3, %v510_v34  ;;  %v523_v37 = vadd.f32 %v520_v35, %v515_v33 }
 0x32e   : > { %v509_v38 = vpop.xlane.xlu0 %508 }
 0x32f   : > { %525 = vst.msk [vmem:[#allocation3] sm:$0xff] %vm512_vm3, %v523_v37  ;;  %v511_v40 = vadd.f32 %v509_v38, %v505_v36 }
 0x330   : > { %v522_v41 = vpop.xlane.xlu1 %521 }
 0x331   : > { %514 = vst.msk [vmem:[#allocation2 + $0x8] sm:$0xff] %vm512_vm3, %v511_v40  ;;  %v524_v42 = vadd.f32 %v522_v41, %v516_v39 }
 0x333   : > { %526 = vst.msk [vmem:[#allocation3 + $0x8] sm:$0xff] %vm512_vm3, %v524_v42 }
 0x334 PF: > { %p529_p0 = scmp.eq.s32.totalorder %s1033_s21, 1 }
 0x336   : > { %p530_p1 = pnand %p529_p0, %p490_p10 }
 0x338   : > { %533 = sbr.rel (%p530_p1) target bundleno = 860 (0x35c), region = 56 }
 0x33d   : > { %v534_v43 = vld [vmem:[#allocation2] sm:$0xff]  ;;  %v538_v44 = vld [vmem:[#allocation3] sm:$0xff]  ;;  %v535_v47 = vld [vmem:[#allocation2 + $0x8] sm:$0xff]  ;;  %vm554_vm4 = vcmask 7168  }
 0x33e   : > { %v536_v45 = vmul.f32 0.00390625, %v534_v43  ;;  %v540_v46 = vmul.f32 0.00390625, %v538_v44  ;;  %v539_v48 = vld [vmem:[#allocation3 + $0x8] sm:$0xff]  ;;  %v537_v49 = vmul.f32 0.00390625, %v535_v47  ;;  %v550_v57 = vld [vmem:[%s1338_s3] sm:$0xff]  ;;  %v551_v58 = vld [vmem:[%s1338_s3 + $0x8] sm:$0xff] }
 0x33f   : > { %v541_v50 = vmul.f32 0.00390625, %v539_v48  ;;  %v557_v63 = vld [vmem:[%s1339_s4] sm:$0xff]  ;;  %v558_v1 = vld [vmem:[%s1339_s4 + $0x8] sm:$0xff] }
 0x340   : > { %v542_v51 = vmul.f32 %v536_v45, %v536_v45  ;;  %v543_v52 = vmul.f32 %v537_v49, %v537_v49 }
 0x342   : > { %v544_v53 = vsub.f32 %v540_v46, %v542_v51  ;;  %v545_v54 = vsub.f32 %v541_v50, %v543_v52 }
 0x344   : > { %v546_v55 = vadd.f32 1e-05, %v544_v53  ;;  %v547_v56 = vadd.f32 1e-05, %v545_v54 }
 0x346   : > { %921 = vrsqrt.f32 %v546_v55 }
 0x347   : > { %923 = vrsqrt.f32 %v547_v56 }
 0x353   : > { %v922_v59 = vpop.eup %921 }
 0x354   : > { %v924_v60 = vpop.eup %923  ;;  %v552_v61 = vmul.f32 %v922_v59, %v550_v57 }
 0x355   : > { %v553_v62 = vmul.f32 %v924_v60, %v551_v58 }
 0x356   : > { %555 = vst.msk [vmem:[#allocation4] sm:$0xff] %vm554_vm4, %v552_v61  ;;  %v559_v0 = vmul.f32 %v552_v61, %v536_v45 }
 0x357   : > { %556 = vst.msk [vmem:[#allocation4 + $0x8] sm:$0xff] %vm554_vm4, %v553_v62  ;;  %v560_v2 = vmul.f32 %v553_v62, %v537_v49 }
 0x358   : > { %v561_v3 = vsub.f32 %v557_v63, %v559_v0 }
 0x359   : > { %v562_v4 = vsub.f32 %v558_v1, %v560_v2 }
 0x35a   : > { %563 = vst.msk [vmem:[#allocation5] sm:$0xff] %vm554_vm4, %v561_v3 }
 0x35b   : > { %564 = vst.msk [vmem:[#allocation5 + $0x8] sm:$0xff] %vm554_vm4, %v562_v4 }
 0x35c PF: > { %p712_p2 = scmp.ne.s32.totalorder %s1037_s22, 1 }
 0x35e   : > { %568 = sbr.rel (%p712_p2) target bundleno = 1004 (0x3ec), region = 60 }
 0x363   : > { %v583_v5 = vld [vmem:[#allocation5] sm:$0xff]  ;;  %v569_v6 = vld [vmem:[#allocation4] sm:$0xff]  ;;  %v1057_v7 = vmov 0   ;;  %v584_v8 = vld [vmem:[#allocation5 + $0x8] sm:$0xff] }
 0x364   : > { %926 = vset.pattern.permute.xlu1 %v1057_v7  ;;  %925 = vset.pattern.permute.xlu0 %v1057_v7  ;;  %v570_v9 = vld [vmem:[#allocation4 + $0x8] sm:$0xff] }
 0x365   : > { %587 = vperm.xlu1 %926, %v583_v5   ;;  %573 = vperm.xlu0 %925, %v569_v6  }
 0x369   : > { %592 = vperm.xlu1 %926, %v584_v8   ;;  %578 = vperm.xlu0 %925, %v570_v9  }
 0x3e0   : > { %v588_v10 = vpop.permute.xlu1 %587  ;;  %v574_v11 = vpop.permute.xlu0 %573 }
 0x3e1   : > { %v581_v12 = vmul.f32 %v574_v11, %v1237_v27 }
 0x3e3   : > { %v595_v13 = vadd.f32 %v588_v10, %v581_v12 }
 0x3e4   : > { %v579_v14 = vpop.permute.xlu0 %578  ;;  %v593_v17 = vpop.permute.xlu1 %592 }
 0x3e5   : > { %v597_v15 = vmax.f32 %v595_v13, 0.0  ;;  %v582_v16 = vmul.f32 %v1235_v26, %v579_v14 }
 0x3e7   : > { %599 = vst [vmem:[%s1240_s26] sm:$0xff] %v597_v15  ;;  %v596_v18 = vadd.f32 %v593_v17, %v582_v16 }
 0x3e9   : > { %v598_v19 = vmax.f32 %v596_v18, 0.0 }
 0x3eb   : > { %600 = vst [vmem:[%s1240_s26 + $0x8] sm:$0xff] %v598_v19 }
 0x3ec PF: > { %s718_s22 = sshll.u32 %s1033_s21, 8  ;;  %s615_s6 = sshll.u32 %s1240_s26, 4  ;;  %s1280_s6 = int_to_ptr.vmem [resolvable:$true] %s615_s6 }
 0x3ed   : > { %s1277_s30 = scalar_lea.hbm %s1340_s5, %s718_s22  ;;  %s1284_s10 = scalar_lea.sflag [#allocation8], %s240_s27 }
 0x3ee   : > { %s953_s11 = scalar_lea.vmem %s1280_s6, 256  ;;  %s1058_s21 = smov [#allocation9]  }
 0x3ef   : > { %p954_p4 = scmp.ne.s32.totalorder %s1280_s6, %s953_s11  ;;  %s957_s12 = sshll.u32 %s1058_s21, 4  ;;  %s958_s12 = int_to_ptr.vmem [resolvable:$false] %s957_s12 }
 0x3f0   : > { %s959_s13 = scalar_lea.vmem %s958_s12, 512  ;;  %p960_p7 = scmp.lt.s32.totalorder %s1280_s6, %s958_s12 }
 0x3f1   : > { %p955_p5 = pnand %p954_p4, %p1143_p3  ;;  %p961_p9 = scmp.lt.s32.totalorder %s959_s13, %s953_s11 }
 0x3f3   : > { %p956_p6 = pneg %p955_p5  ;;  %p962_p8 = por %p961_p9, %p960_p7 }
 0x3f5   : > { %p963_p10 = pnand %p962_p8, %p956_p6 }
 0x3f7   : > { %966 = shalt.err (!%p963_p10)
}
 0x3f8   : > { %s967_s27 = scalar_lea.hbm %s1277_s30, 256  ;;  %s971_s15 = scalar_lea.hbm %s1340_s5, 512 }
 0x3f9   : > { %p968_p11 = scmp.ne.s32.totalorder %s1277_s30, %s967_s27  ;;  %p972_p0 = scmp.lt.s32.totalorder %s1277_s30, %s1340_s5 }
 0x3fa   : > { %p973_p1 = scmp.lt.s32.totalorder %s971_s15, %s967_s27 }
 0x3fb   : > { %p969_p12 = pnand %p968_p11, %p1143_p3 }
 0x3fc   : > { %p974_p2 = por %p973_p1, %p972_p0 }
 0x3fd   : > { %p970_p13 = pneg %p969_p12 }
 0x3ff   : > { %p975_p4 = pnand %p974_p2, %p970_p13 }
 0x401   : > { %978 = shalt.err (!%p975_p4)
}
 0x402   : > { %s1059_s17 = smov 128   ;;  %s1060_s11 = smov 8  }
 0x403   : > { %835 = dma.vmem_to_hbm [thread:$0]  (%p1143_p3), %s1280_s6, 256, %s1277_s30, %s1284_s10, %s1059_s17, %s1059_s17, %s1060_s11  }
 0x404 PF: > { %p847_p5 = scmp.ge.s32.totalorder %s1049_s25, 2  ;;  %s630_s21 = sand.u32 1, %s1021_s18  }
 0x405   : > { %p1345_p6 = scmp.ne.s32.totalorder %s1342_s9, 0  ;;  %s631_s12 = scalar_lea.sflag [#allocation8], %s630_s21 }
 0x407   : > { %p842_p7 = pnand %p847_p5, %p1345_p6 }
 0x409   : > { %p843_p9 = pneg %p842_p7 }
 0x40b   : > { %1016 = dma.done.wait (%p843_p9), %s631_s12, 256  }
 0x40c   : > { %1018 = vsyncadd (%p843_p9), %s631_s12, 4294967040  ;;  %s19_s25 = sadd.s32 1, %s1049_s25   ;;  %s1346_s18 = smov %s1025_s19 }
 0x40d   : > { %p16_p8 = scmp.ge.s32.totalorder %s19_s25, 6   ;;  %s1347_s19 = smov %s1029_s20 }
 0x40e   : > { %s1348_s20 = smov %s1152_s8  ;;  %s1349_s21 = smov %s1041_s23 }
 0x40f   : > { %s1350_s22 = smov %s1045_s24  ;;  %s1351_s23 = smov %s1354_s28 }
 0x410   : > { %s1352_s24 = smov %s1358_s29  ;;  %18 = sbr.rel (!%p16_p8) target bundleno = 6 (0x6), region = 96 }
 0x415   :  { %636 = vsyncpa [#allocation7], 1 }
 0x416   :  { %638 = vsyncpa [#allocation7 + $0x1], 1 }
 0x417   :  { %639 = vsyncpa [#allocation8], 1 }
 0x418   :  { %641 = vsyncpa [#allocation8 + $0x1], 1 }

</bundles_post_ra>
